<compile_context>
chip_gen: v5e
topology: v5e:2x2
jax: 0.10.0
libtpu: 0.0.40
codegen_flags: <defaults>
</compile_context>

<pallas_src>
import functools

import jax
import jax.numpy as jnp
from jax.experimental import pallas as pl
from jax.experimental.pallas import tpu as pltpu


def _compressor_kernel(x_ref, w_ref, b_ref, o_ref, acc_ref):
    # x_ref: (TM, TK) bf16   w_ref: (TK, TN) bf16   b_ref: (1, TN) f32
    # o_ref: (TM, TN) f32    acc_ref: (TM, TN) f32 scratch
    k = pl.program_id(2)

    @pl.when(k == 0)
    def _():
        acc_ref[...] = jnp.zeros_like(acc_ref)

    acc_ref[...] += jnp.dot(
        x_ref[...], w_ref[...], preferred_element_type=jnp.float32
    )

    @pl.when(k == pl.num_programs(2) - 1)
    def _():
        o_ref[...] = (acc_ref[...] + b_ref[...]).astype(o_ref.dtype)


@functools.partial(jax.jit, static_argnames=("compute_dtype",))
def linear_feature_compressor(feats, w_mu, b_mu, w_logvar, b_logvar,
                              compute_dtype=jnp.bfloat16):
    """feats: (B, C, H, W). w_*: (K, O) (= torch weight.T), b_*: (O,) or (1, O).

    Returns (mu, logvar), each (B, O) float32."""
    B = feats.shape[0]
    x = feats.reshape(B, -1)                  # matches torch .view(B, -1)
    K = x.shape[1]
    O = w_mu.shape[1]

    # --- fuse mu / logvar into one lane-dense matmul ------------------------
    w = jnp.concatenate([w_mu, w_logvar], axis=1)                    # (K, 2O)
    b = jnp.concatenate(
        [b_mu.reshape(1, O), b_logvar.reshape(1, O)], axis=1)        # (1, 2O)

    N = 2 * O
    Np = max(128, pl.cdiv(N, 128) * 128)       # pad output dim to 128 lanes
    if Np != N:
        w = jnp.pad(w, ((0, 0), (0, Np - N)))
        b = jnp.pad(b, ((0, 0), (0, Np - N)))

    # --- tile sizes (sized well under the 32 MiB scoped-VMEM default) -------
    TK = K if K <= 512 else 512
    Kp = pl.cdiv(K, TK) * TK
    if Kp != K:                                # zero K-pad: contributes nothing
        x = jnp.pad(x, ((0, 0), (0, Kp - K)))
        w = jnp.pad(w, ((0, Kp - K), (0, 0)))

    TM = B if B <= 128 else 128
    Bp = pl.cdiv(B, TM) * TM
    if Bp != B:
        x = jnp.pad(x, ((0, Bp - B), (0, 0)))

    TN = Np if Np <= 512 else 512

    # bf16 operands, fp32 accumulation (halves HBM bytes of the weight stream)
    x = x.astype(compute_dtype)
    w = w.astype(compute_dtype)
    b = b.astype(jnp.float32)

    grid = (Bp // TM, Np // TN, Kp // TK)      # (B parallel, N parallel, K red.)

    flops = 2 * Bp * Kp * Np
    bytes_accessed = (x.size * x.dtype.itemsize + w.size * w.dtype.itemsize
                      + b.size * 4 + Bp * Np * 4)

    out = pl.pallas_call(
        _compressor_kernel,
        out_shape=jax.ShapeDtypeStruct((Bp, Np), jnp.float32),
        grid_spec=pltpu.PrefetchScalarGridSpec(
            num_scalar_prefetch=0,
            grid=grid,
            in_specs=[
                pl.BlockSpec((TM, TK), lambda bi, ni, ki: (bi, ki)),  # x
                pl.BlockSpec((TK, TN), lambda bi, ni, ki: (ki, ni)),  # W (B-invariant)
                pl.BlockSpec((1, TN), lambda bi, ni, ki: (0, ni)),    # bias
            ],
            out_specs=pl.BlockSpec((TM, TN), lambda bi, ni, ki: (bi, ni)),
            scratch_shapes=[pltpu.VMEM((TM, TN), jnp.float32)],
        ),
        compiler_params=pltpu.CompilerParams(
            dimension_semantics=("parallel", "parallel", "arbitrary"),
            vmem_limit_bytes=32 * 1024 * 1024,
        ),
        cost_estimate=pl.CostEstimate(
            flops=flops, transcendentals=0, bytes_accessed=bytes_accessed),
    )(x, w, b)

    mu = out[:B, :O]
    logvar = out[:B, O:2 * O]
    return mu, logvar


if __name__ == "__main__":
    # Small shapes consistent with the module: feats (B, C, H, W) flattened to
    # in_channels = C*H*W, compressed to out_channels.
    B, C, H, W = 2, 4, 16, 16
    in_channels = C * H * W          # 1024
    out_channels = 32

    key = jax.random.PRNGKey(0)
    k_feats, k_wmu, k_bmu, k_wlv, k_blv = jax.random.split(key, 5)

    feats = jax.random.normal(k_feats, (B, C, H, W), dtype=jnp.float32)

    # Deterministic parameter init (roughly PyTorch's U(-1/sqrt(in), 1/sqrt(in)))
    bound = 1.0 / jnp.sqrt(in_channels)
    w_mu = jax.random.uniform(k_wmu, (in_channels, out_channels),
                              minval=-bound, maxval=bound, dtype=jnp.float32)
    b_mu = jax.random.uniform(k_bmu, (out_channels,),
                              minval=-bound, maxval=bound, dtype=jnp.float32)
    w_lv = jax.random.uniform(k_wlv, (in_channels, out_channels),
                              minval=-bound, maxval=bound, dtype=jnp.float32)
    b_lv = jax.random.uniform(k_blv, (out_channels,),
                              minval=-bound, maxval=bound, dtype=jnp.float32)

    mu, logvar = linear_feature_compressor(feats, w_mu, b_mu, w_lv, b_lv)
    jax.block_until_ready((mu, logvar))

    # Reference check in plain fp32 JAX (tolerance loosened for bf16 operands,
    # accumulation is still fp32 on the MXU).
    x = feats.reshape(B, -1)
    mu_ref = x @ w_mu + b_mu
    lv_ref = x @ w_lv + b_lv
    assert mu.shape == (B, out_channels) and logvar.shape == (B, out_channels)
    assert jnp.allclose(mu, mu_ref, atol=2e-2, rtol=2e-2)
    assert jnp.allclose(logvar, lv_ref, atol=2e-2, rtol=2e-2)

    print("KERNEL_OK")
</pallas_src>

<mosaic_0001>
module attributes {stable_mosaic.version = 11 : i64} {
  func.func @_compressor_kernel(%arg0: i32, %arg1: i32, %arg2: i32, %arg3: memref<2x512xbf16, #tpu.memory_space<vmem>>, %arg4: memref<512x128xbf16, #tpu.memory_space<vmem>>, %arg5: memref<1x128xf32, #tpu.memory_space<vmem>>, %arg6: memref<2x128xf32, #tpu.memory_space<vmem>>, %arg7: memref<2x128xf32, #tpu.memory_space<vmem>>) attributes {dimension_semantics = [#tpu.dimension_semantics<parallel>, #tpu.dimension_semantics<parallel>, #tpu.dimension_semantics<arbitrary>], iteration_bounds = array<i64: 1, 1, 2>, scalar_prefetch = 0 : i64, scratch_operands = 1 : i64, tpu.core_type = #tpu.core_type<tc>, window_params = [{transform_indices = @transform_0, window_bounds = array<i64: 2, 512>}, {transform_indices = @transform_1, window_bounds = array<i64: 512, 128>}, {transform_indices = @transform_2, window_bounds = array<i64: 1, 128>}, {transform_indices = @transform_3, window_bounds = array<i64: 2, 128>}]} {
    %c0_i32 = arith.constant 0 : i32
    %0 = arith.cmpi eq, %arg2, %c0_i32 : i32
    %1 = arith.extui %0 : i1 to i32
    %c0_i32_0 = arith.constant 0 : i32
    %2 = arith.cmpi ne, %1, %c0_i32_0 : i32
    scf.if %2 {
      %cst_9 = arith.constant 0.000000e+00 : f32
      %12 = vector.broadcast %cst_9 : f32 to vector<2x128xf32>
      %c0_10 = arith.constant 0 : index
      %c0_11 = arith.constant 0 : index
      %13 = vector.load %arg7[%c0_10, %c0_11] : memref<2x128xf32, #tpu.memory_space<vmem>>, vector<2x128xf32>
      tpu.vector_store %arg7[%c0_10, %c0_11], %12 {strides = array<i32>} : memref<2x128xf32, #tpu.memory_space<vmem>>, vector<2x128xf32>,
    } else {
    }
    %c0 = arith.constant 0 : index
    %c0_1 = arith.constant 0 : index
    %3 = vector.load %arg7[%c0, %c0_1] : memref<2x128xf32, #tpu.memory_space<vmem>>, vector<2x128xf32>
    %c0_2 = arith.constant 0 : index
    %c0_3 = arith.constant 0 : index
    %4 = vector.load %arg3[%c0_2, %c0_3] : memref<2x512xbf16, #tpu.memory_space<vmem>>, vector<2x512xbf16>
    %c0_4 = arith.constant 0 : index
    %c0_5 = arith.constant 0 : index
    %5 = vector.load %arg4[%c0_4, %c0_5] : memref<512x128xbf16, #tpu.memory_space<vmem>>, vector<512x128xbf16>
    %cst = arith.constant dense<0.000000e+00> : vector<2x128xf32>
    %6 = tpu.matmul %4, %5, %cst {dimension_numbers = #tpu.dot_dimension_numbers<[1], [0], [0], [1], [0, 0, 1, 1], [], []>} : vector<2x512xbf16>, vector<512x128xbf16>, vector<2x128xf32> -> vector<2x128xf32>
    %7 = arith.addf %3, %6 : vector<2x128xf32>
    %c0_6 = arith.constant 0 : index
    %c0_7 = arith.constant 0 : index
    %8 = vector.load %arg7[%c0_6, %c0_7] : memref<2x128xf32, #tpu.memory_space<vmem>>, vector<2x128xf32>
    tpu.vector_store %arg7[%c0_6, %c0_7], %7 {strides = array<i32>} : memref<2x128xf32, #tpu.memory_space<vmem>>, vector<2x128xf32>,
    %c1_i32 = arith.constant 1 : i32
    %9 = arith.cmpi eq, %arg2, %c1_i32 : i32
    %10 = arith.extui %9 : i1 to i32
    %c0_i32_8 = arith.constant 0 : i32
    %11 = arith.cmpi ne, %10, %c0_i32_8 : i32
    scf.if %11 {
      %c0_9 = arith.constant 0 : index
      %c0_10 = arith.constant 0 : index
      %12 = vector.load %arg7[%c0_9, %c0_10] : memref<2x128xf32, #tpu.memory_space<vmem>>, vector<2x128xf32>
      %c0_11 = arith.constant 0 : index
      %c0_12 = arith.constant 0 : index
      %13 = vector.load %arg5[%c0_11, %c0_12] : memref<1x128xf32, #tpu.memory_space<vmem>>, vector<1x128xf32>
      %14 = vector.broadcast %13 : vector<1x128xf32> to vector<2x128xf32>
      %15 = arith.addf %12, %14 : vector<2x128xf32>
      %c0_13 = arith.constant 0 : index
      %c0_14 = arith.constant 0 : index
      %16 = vector.load %arg6[%c0_13, %c0_14] : memref<2x128xf32, #tpu.memory_space<vmem>>, vector<2x128xf32>
      tpu.vector_store %arg6[%c0_13, %c0_14], %15 {strides = array<i32>} : memref<2x128xf32, #tpu.memory_space<vmem>>, vector<2x128xf32>,
    } else {
    }
    return
  }
  func.func @transform_0(%arg0: i32, %arg1: i32, %arg2: i32) -> (i32, i32) {
    %c0_i32 = arith.constant 0 : i32
    return %arg0, %arg2 : i32, i32
  }
  func.func @transform_1(%arg0: i32, %arg1: i32, %arg2: i32) -> (i32, i32) {
    %c0_i32 = arith.constant 0 : i32
    return %arg2, %arg1 : i32, i32
  }
  func.func @transform_2(%arg0: i32, %arg1: i32, %arg2: i32) -> (i32, i32) {
    %c0_i32 = arith.constant 0 : i32
    %c0_i32_0 = arith.constant 0 : i32
    return %c0_i32, %arg1 : i32, i32
  }
  func.func @transform_3(%arg0: i32, %arg1: i32, %arg2: i32) -> (i32, i32) {
    %c0_i32 = arith.constant 0 : i32
    return %arg0, %arg1 : i32, i32
  }
}

</mosaic_0001>

<bundles_post_ra>
// kernel: linear_feature_compressor.1
= control target key start
LH: loop header
LB: loop body
LE: loop exit
PB: predicated region body
PF: predicated region fallthrough
CT: control target
= control target key end

     0   :  { %s940_s12 = smov 0   ;;  %s942_s13 = smov 0   ;;  %s1027_s0 = inlined_call_operand.vmem [shape: bf16[2,1024], index: 0, kind: input, shape index: {}]   ;;  %s1028_s1 = inlined_call_operand.vmem [shape: bf16[1024,128], index: 1, kind: input, shape index: {}]   ;;  %s1029_s2 = inlined_call_operand.vmem [shape: f32[1,128], index: 2, kind: input, shape index: {}]   ;;  %s1030_s3 = inlined_call_operand.vmem [shape: f32[2,128], index: 3, kind: output, shape index: {}]  }
   0x1   :  { %s944_s14 = smov 0  }
   0x2 LB: > { %s25_s15 = sadd.s32 1, %s913_s13  ;;  %p700_p0 = scmp.ge.s32.totalorder %s917_s14, 1  ;;  %s917_s14 = sphi %s944_s14, %s13_s14   ;;  %s913_s13 = sphi %s942_s13, %s1032_s13   ;;  %s909_s12 = sphi %s940_s12, %s1031_s12  }
   0x3   : > { %p26_p1 = scmp.ge.s32.totalorder %s25_s15, 2  ;;  %p188_p2 = scmp.lt.s32.totalorder %s917_s14, 3 }
   0x5   : > { %s1034_s15 = smov (%p26_p1, %s25_s15), 0  ;;  %p189_p3 = pnand %p700_p0, %p188_p2 }
   0x6   : > { %s701_s16 = sshll.u32 (!%p189_p3), %s909_s12, 2  ;;  %s702_s17 = sshll.u32 (!%p189_p3), %s909_s12, 6 }
   0x7   : > { %192 = sbr.rel (%p189_p3) target bundleno = 204 (0xcc), region = 32  ;;  %p231_p4 = scmp.lt.s32.totalorder (!%p189_p3), %s701_s16, 7 }
   0x8   : > { %p238_p5 = scmp.lt.s32.totalorder (!%p189_p3), %s702_s17, 127  ;;  %p704_p6 = scmp.ne.s32.totalorder (!%p189_p3), %s909_s12, 0 }
   0xc   : > { %s1036_s16 = smov (!%p231_p4, %s701_s16), 7  ;;  %s1038_s17 = smov (!%p238_p5, %s702_s17), 127 }
   0xd   : > { %s235_s20 = scalar_lea.vmem %s1027_s0, %s1036_s16  ;;  %s703_s21 = sshll.u32 %s1038_s17, 2 }
   0xe   : > { %s971_s24 = scalar_lea.vmem %s1028_s1, %s703_s21  ;;  %259 = sbr.rel (%p704_p6) target bundleno = 21 (0x15), region = 36 }
  0x13   : > { %v919_v0 = vmov 0.0  }
  0x14   : > { %260 = vst [vmem:[#allocation2] sm:$0x3] %v919_v0 }
  0x15 PF: > { %v844_v1 = vld [vmem:[%s971_s24 + $0x38] sm:$0xff]  ;;  %v843_v5 = vld [vmem:[%s971_s24 + $0x30] sm:$0xff]  ;;  %v842_v9 = vld [vmem:[%s971_s24 + $0x28] sm:$0xff]  ;;  %p833_p7 = scmp.ne.s32.totalorder %s909_s12, 1 }
  0x16   : > { %v852_v2 = vld [vmem:[%s971_s24 + $0x78] sm:$0xff]  ;;  %529 = vmatpush.bf16.msra.mxu0 %v844_v1  ;;  %v851_v6 = vld [vmem:[%s971_s24 + $0x70] sm:$0xff]  ;;  %v850_v10 = vld [vmem:[%s971_s24 + $0x68] sm:$0xff] }
  0x17   : > { %v860_v3 = vld [vmem:[%s971_s24 + $0xb8] sm:$0xff]  ;;  %542 = vmatpush.bf16.msra.mxu1 %v852_v2  ;;  %v859_v7 = vld [vmem:[%s971_s24 + $0xb0] sm:$0xff]  ;;  %v858_v11 = vld [vmem:[%s971_s24 + $0xa8] sm:$0xff] }
  0x18   : > { %v868_v4 = vld [vmem:[%s971_s24 + $0xf8] sm:$0xff]  ;;  %555 = vmatpush.bf16.msra.mxu2 %v860_v3  ;;  %v867_v8 = vld [vmem:[%s971_s24 + $0xf0] sm:$0xff]  ;;  %v866_v12 = vld [vmem:[%s971_s24 + $0xe8] sm:$0xff] }
  0x19   : > { %568 = vmatpush.bf16.msra.mxu3 %v868_v4  ;;  %v841_v13 = vld [vmem:[%s971_s24 + $0x20] sm:$0xff]  ;;  %v840_v18 = vld [vmem:[%s971_s24 + $0x18] sm:$0xff]  ;;  %v839_v22 = vld [vmem:[%s971_s24 + $0x10] sm:$0xff] }
  0x1a   : > { %530 = vmatpush.bf16.msra.mxu0 %v843_v5  ;;  %v849_v14 = vld [vmem:[%s971_s24 + $0x60] sm:$0xff]  ;;  %v848_v19 = vld [vmem:[%s971_s24 + $0x58] sm:$0xff]  ;;  %v847_v23 = vld [vmem:[%s971_s24 + $0x50] sm:$0xff] }
  0x1b   : > { %543 = vmatpush.bf16.msra.mxu1 %v851_v6  ;;  %v262_v15 = vld [vmem:[%s235_s20] sm:$0xf]  ;;  %v856_v20 = vld [vmem:[%s971_s24 + $0x98] sm:$0xff]  ;;  %v855_v24 = vld [vmem:[%s971_s24 + $0x90] sm:$0xff] }
  0x1c   : > { %556 = vmatpush.bf16.msra.mxu2 %v859_v7  ;;  %v857_v16 = vld [vmem:[%s971_s24 + $0xa0] sm:$0xff]  ;;  %328 = vst [vmem:[#allocation1] ss:$9 sm:$0xff] %v262_v15  ;;  %v864_v21 = vld [vmem:[%s971_s24 + $0xd8] sm:$0xff]  ;;  %v863_v25 = vld [vmem:[%s971_s24 + $0xd0] sm:$0xff] }
  0x1d   : > { %569 = vmatpush.bf16.msra.mxu3 %v867_v8  ;;  %v865_v17 = vld [vmem:[%s971_s24 + $0xe0] sm:$0xff]  ;;  %v838_v26 = vld [vmem:[%s971_s24 + $0x8] sm:$0xff] }
  0x1e   : > { %531 = vmatpush.bf16.msra.mxu0 %v842_v9  ;;  %v846_v27 = vld [vmem:[%s971_s24 + $0x48] sm:$0xff]  ;;  %v837_v30 = vld [vmem:[%s971_s24] sm:$0xff] }
  0x1f   : > { %544 = vmatpush.bf16.msra.mxu1 %v850_v10  ;;  %v854_v28 = vld [vmem:[%s971_s24 + $0x88] sm:$0xff]  ;;  %v845_v31 = vld [vmem:[%s971_s24 + $0x40] sm:$0xff] }
  0x20   : > { %557 = vmatpush.bf16.msra.mxu2 %v858_v11  ;;  %v862_v29 = vld [vmem:[%s971_s24 + $0xc8] sm:$0xff]  ;;  %v853_v32 = vld [vmem:[%s971_s24 + $0x80] sm:$0xff] }
  0x21   : > { %570 = vmatpush.bf16.msra.mxu3 %v866_v12  ;;  %v861_v33 = vld [vmem:[%s971_s24 + $0xc0] sm:$0xff]  ;;  %v261_v46 = vld [vmem:[#allocation2] sm:$0x3] }
  0x22   : > { %532 = vmatpush.bf16.msra.mxu0 %v841_v13 }
  0x23   : > { %545 = vmatpush.bf16.msra.mxu1 %v849_v14  ;;  %v329_v34 = vld [vmem:[#allocation1] sm:$0xff]  ;;  %v330_v35 = vld [vmem:[#allocation1 + $0x9] sm:$0xff]  ;;  %v331_v36 = vld [vmem:[#allocation1 + $0x12] sm:$0xff] }
  0x24   : > { %558 = vmatpush.bf16.msra.mxu2 %v857_v16  ;;  %v332_v37 = vld [vmem:[#allocation1 + $0x1b] sm:$0xff] }
  0x25   : > { %571 = vmatpush.bf16.msra.mxu3 %v865_v17 }
  0x26   : > { %533 = vmatpush.bf16.msra.mxu0 %v840_v18 }
  0x27   : > { %546 = vmatpush.bf16.msra.mxu1 %v848_v19 }
  0x28   : > { %559 = vmatpush.bf16.msra.mxu2 %v856_v20 }
  0x29   : > { %572 = vmatpush.bf16.msra.mxu3 %v864_v21 }
  0x2a   : > { %534 = vmatpush.bf16.msra.mxu0 %v839_v22 }
  0x2b   : > { %547 = vmatpush.bf16.msra.mxu1 %v847_v23 }
  0x2c   : > { %560 = vmatpush.bf16.msra.mxu2 %v855_v24 }
  0x2d   : > { %573 = vmatpush.bf16.msra.mxu3 %v863_v25 }
  0x2e   : > { %535 = vmatpush.bf16.msra.mxu0 %v838_v26 }
  0x2f   : > { %548 = vmatpush.bf16.msra.mxu1 %v846_v27 }
  0x30   : > { %561 = vmatpush.bf16.msra.mxu2 %v854_v28 }
  0x31   : > { %574 = vmatpush.bf16.msra.mxu3 %v862_v29 }
  0x32   : > { %536 = vmatpush.bf16.msra.mxu0 %v837_v30 }
  0x33   : > { %549 = vmatpush.bf16.msra.mxu1 %v845_v31 }
  0x34   : > { %562 = vmatpush.bf16.msra.mxu2 %v853_v32 }
  0x35   : > { %575 = vmatpush.bf16.msra.mxu3 %v861_v33  ;;  %537 = vmatmul.bf16.vlgmr.msra.gmra.mxu0 %v329_v34 }
  0x36   : > { %550 = vmatmul.bf16.vlgmr.msra.gmra.mxu1 %v330_v35 }
  0x37   : > { %563 = vmatmul.bf16.vlgmr.msra.gmra.mxu2 %v331_v36 }
  0x38   : > { %576 = vmatmul.bf16.vlgmr.msra.gmra.mxu3 %v332_v37 }
  0xb2   : > { %v538_v38 = vpop.f32.mrf.mxu0 }
  0xb3   : > { %v551_v39 = vpop.f32.mrf.mxu1 }
  0xb4   : > { %v552_v40 = vadd.f32 %v551_v39, %v538_v38 }
  0xba   : > { %v564_v41 = vpop.f32.mrf.mxu2  ;;  %v540_v44 = vpop.f32.mrf.mxu0 }
  0xbb   : > { %v577_v42 = vpop.f32.mrf.mxu3  ;;  %v565_v43 = vadd.f32 %v564_v41, %v552_v40  ;;  %v553_v45 = vpop.f32.mrf.mxu1 }
  0xbd   : > { %v578_v47 = vadd.f32 %v577_v42, %v565_v43 }
  0xbf   : > { %v581_v48 = vadd.f32 %v578_v47, %v261_v46  ;;  %586 = sbr.rel (%p833_p7) target bundleno = 204 (0xcc), region = 40 }
  0xc1   : > { %582 = vst [vmem:[#allocation2] sm:$0x3] %v581_v48 }
  0xc2   : > { %v566_v49 = vpop.f32.mrf.mxu2 }
  0xc3   : > { %v579_v50 = vpop.f32.mrf.mxu3 }
  0xc4   : > { %v894_v52 = vld [vmem:[%s1029_s2] ss:$0 sm:$0xff] }
  0xc8   : > { %v587_v51 = vld [vmem:[#allocation2] sm:$0x3] }
  0xc9   : > { %v592_v53 = vadd.f32 %v894_v52, %v587_v51 }
  0xcb   : > { %593 = vst [vmem:[%s1030_s3] sm:$0x3] %v592_v53 }
  0xcc PF: > { %s13_s14 = sadd.s32 1, %s917_s14   ;;  %s1031_s12 = smov %s913_s13 }
  0xcd   : > { %p10_p8 = scmp.ge.s32.totalorder %s13_s14, 4   ;;  %s1032_s13 = smov %s1034_s15 }
  0xcf   :  { %12 = sbr.rel (!%p10_p8) target bundleno = 2 (0x2), region = 76 }

</bundles_post_ra>
